<compile_context>
chip_gen: v7x
topology: tpu7x:2x2x1
jax: 0.10.0
libtpu: 0.0.40
codegen_flags: <defaults>
</compile_context>

<pallas_src>
from functools import partial

import jax
import jax.numpy as jnp
from jax.experimental import pallas as pl
from jax.experimental.pallas import tpu as pltpu

SUBLANES = 8            # one (8, 128) f32 vreg strip
LANES = 128
MAX_TILE_ROWS = 256     # up to 256 sublane-rows (32768 priors) per grid step
VMEM_BUDGET_BYTES = 24 * 1024 * 1024   # double-buffered block budget (v7x-safe)


def _round_up(x, m):
    return ((x + m - 1) // m) * m


def _smooth_l1(d):
    ad = jnp.abs(d)
    return jnp.where(ad < 1.0, 0.5 * d * d, ad - 0.5)


def _multibox_kernel(loc_ref, loct_ref, fc_ref, fct_ref, pri_ref, ct_ref,
                     conf_ref, ce_ref, part_ref, *,
                     num_classes, v0, v1, n_strips):
    """One grid step = n_strips * 8 sublane-rows of 128 priors each.

    Inputs (field-major, priors dense along sublanes x lanes):
      loc_ref  : (4, T, 128)  loc predictions (dx, dy, dw, dh)
      loct_ref : (4, T, 128)  encoded loc targets
      fc_ref   : (8, T, 128)  four-corner predictions (x0,y0,...,x3,y3)
      fct_ref  : (8, T, 128)  four-corner targets
      pri_ref  : (4, T, 128)  priors (cx, cy, w, h), broadcast over batch
      ct_ref   : (T, 128)     int32 ground-truth class (0 = background / pad)
      conf_ref : (C, T, 128)  class logits
    Outputs:
      ce_ref   : (T, 128)         per-prior  log_sum_exp(conf) - conf[conf_t]
      part_ref : (1, 3, 8, 128)   per-tile partial sums of the pos-masked
                                  loc / four-corner / border smooth-L1 losses
    """
    inv_v0 = 1.0 / v0
    acc_l = jnp.zeros((SUBLANES, LANES), jnp.float32)
    acc_fc = jnp.zeros((SUBLANES, LANES), jnp.float32)
    acc_b = jnp.zeros((SUBLANES, LANES), jnp.float32)

    # Static strip loop: every operand slice / intermediate is one (8,128) vreg.
    for s in range(n_strips):
        sl = slice(s * SUBLANES, (s + 1) * SUBLANES)

        ct = ct_ref[sl, :]
        pos = (ct > 0).astype(jnp.float32)

        # ---- localization smooth-L1 -------------------------------------
        lp = [loc_ref[c, sl, :] for c in range(4)]
        ll = _smooth_l1(lp[0] - loct_ref[0, sl, :])
        for c in range(1, 4):
            ll = ll + _smooth_l1(lp[c] - loct_ref[c, sl, :])
        acc_l = acc_l + ll * pos

        # ---- four-corner smooth-L1 ---------------------------------------
        cp = [fc_ref[c, sl, :] for c in range(8)]
        lfc = _smooth_l1(cp[0] - fct_ref[0, sl, :])
        for c in range(1, 8):
            lfc = lfc + _smooth_l1(cp[c] - fct_ref[c, sl, :])
        acc_fc = acc_fc + lfc * pos

        # ---- border loss ---------------------------------------------------
        pcx = pri_ref[0, sl, :]
        pcy = pri_ref[1, sl, :]
        pw = pri_ref[2, sl, :]
        ph = pri_ref[3, sl, :]

        # decode(loc, priors, variances) -> corner-form box
        w = pw * jnp.exp(lp[2] * v1)
        h = ph * jnp.exp(lp[3] * v1)
        x1 = pcx + lp[0] * v0 * pw - 0.5 * w
        y1 = pcy + lp[1] * v0 * ph - 0.5 * h
        x2 = x1 + w
        y2 = y1 + h

        # decode_four_corners: corner = prior center + offset * v0 * prior wh.
        # TODO(synk): decode_four_corners helper is not in the spec; the
        # standard center-offset decoding of the four-corner SSD variant is
        # assumed (matches the pure-JAX reference below).
        vx = v0 * pw
        vy = v0 * ph
        cx0 = pcx + cp[0] * vx
        cy0 = pcy + cp[1] * vy
        cx1 = pcx + cp[2] * vx
        cy1 = pcy + cp[3] * vy
        cx2 = pcx + cp[4] * vx
        cy2 = pcy + cp[5] * vy
        cx3 = pcx + cp[6] * vx
        cy3 = pcy + cp[7] * vy

        lb = (_smooth_l1((jnp.minimum(cx0, cx3) - x1) * inv_v0)      # left
              + _smooth_l1((jnp.minimum(cy0, cy1) - y1) * inv_v0)    # top
              + _smooth_l1((jnp.maximum(cx1, cx2) - x2) * inv_v0)    # right
              + _smooth_l1((jnp.maximum(cy2, cy3) - y2) * inv_v0))   # bottom
        acc_b = acc_b + lb * pos

        # ---- per-prior classification value  lse(conf) - conf[conf_t] ------
        c0 = conf_ref[0, sl, :]
        m = c0
        for c in range(1, num_classes):
            m = jnp.maximum(m, conf_ref[c, sl, :])
        ssum = jnp.exp(c0 - m)
        sel = jnp.where(ct == 0, c0, 0.0)        # integer class compare
        for c in range(1, num_classes):
            cc = conf_ref[c, sl, :]
            ssum = ssum + jnp.exp(cc - m)
            sel = sel + jnp.where(ct == c, cc, 0.0)
        ce_ref[sl, :] = m + jnp.log(ssum) - sel

    part_ref[0, 0, :, :] = acc_l
    part_ref[0, 1, :, :] = acc_fc
    part_ref[0, 2, :, :] = acc_b


def multibox_loss_four_corners_with_border(
        loc_data, conf_data, priors, four_corners_data,
        loc_t, conf_t, four_corners_t,
        *, variances=(0.1, 0.2), negpos_ratio=3, max_tile_rows=MAX_TILE_ROWS):
    """Forward of MultiBoxLoss_four_corners_with_border (post-matching part).

    Returns (loss_l, loss_c, loss_four_corners, loss_border), each already /N.
    """
    # TODO(synk): match_four_corners (GT<->prior matching + target encoding) is
    # a host-side data-prep loop in the original repo; loc_t / conf_t /
    # four_corners_t are assumed pre-matched here.
    f32 = jnp.float32
    num, num_priors, _ = loc_data.shape
    num_classes = conf_data.shape[-1]
    M = num * num_priors
    priors = priors[:num_priors]

    # ---- field-major views (no packed slab; one moveaxis per input) --------
    def field_major(x, k):
        return jnp.moveaxis(x.astype(f32), -1, 0).reshape(k, M)

    locT = field_major(loc_data, 4)
    loctT = field_major(loc_t, 4)
    fcT = field_major(four_corners_data, 8)
    fctT = field_major(four_corners_t, 8)
    confT = field_major(conf_data, num_classes)
    priT = jnp.broadcast_to(priors.astype(f32).T[:, None, :],
                            (4, num, num_priors)).reshape(4, M)
    ct_flat = conf_t.astype(jnp.int32).reshape(M)

    # ---- tile sizing: as large as the VMEM budget allows -------------------
    rows = pl.cdiv(M, LANES)
    # double-buffered bytes per sublane-row:
    #   28 f32 geometry fields + C logits + int32 conf_t in, + f32 ce out
    row_bytes = (28 + num_classes + 1 + 1) * LANES * 4 * 2
    vmem_cap = max(SUBLANES,
                   (VMEM_BUDGET_BYTES // row_bytes) // SUBLANES * SUBLANES)
    cap = max(SUBLANES, min(max_tile_rows // SUBLANES * SUBLANES, vmem_cap))
    num_tiles = pl.cdiv(rows, cap)
    tile_rows = _round_up(pl.cdiv(rows, num_tiles), SUBLANES)
    rows_pad = num_tiles * tile_rows
    pad = rows_pad * LANES - M

    def pad_fm(x):   # (k, M) -> (k, rows_pad, 128); zero pad => conf_t = 0
        return jnp.pad(x, ((0, 0), (0, pad))).reshape(x.shape[0], rows_pad, LANES)

    locT, loctT, fcT, fctT, priT, confT = (
        pad_fm(locT), pad_fm(loctT), pad_fm(fcT), pad_fm(fctT),
        pad_fm(priT), pad_fm(confT))
    ct2 = jnp.pad(ct_flat, (0, pad)).reshape(rows_pad, LANES)

    kernel = partial(_multibox_kernel, num_classes=num_classes,
                     v0=float(variances[0]), v1=float(variances[1]),
                     n_strips=tile_rows // SUBLANES)

    ce_map, partials = pl.pallas_call(
        kernel,
        out_shape=(jax.ShapeDtypeStruct((rows_pad, LANES), f32),
                   jax.ShapeDtypeStruct((num_tiles, 3, SUBLANES, LANES), f32)),
        grid=(num_tiles,),
        in_specs=[
            pl.BlockSpec((4, tile_rows, LANES), lambda i: (0, i, 0)),
            pl.BlockSpec((4, tile_rows, LANES), lambda i: (0, i, 0)),
            pl.BlockSpec((8, tile_rows, LANES), lambda i: (0, i, 0)),
            pl.BlockSpec((8, tile_rows, LANES), lambda i: (0, i, 0)),
            pl.BlockSpec((4, tile_rows, LANES), lambda i: (0, i, 0)),
            pl.BlockSpec((tile_rows, LANES), lambda i: (i, 0)),
            pl.BlockSpec((num_classes, tile_rows, LANES), lambda i: (0, i, 0)),
        ],
        out_specs=(
            pl.BlockSpec((tile_rows, LANES), lambda i: (i, 0)),
            pl.BlockSpec((1, 3, SUBLANES, LANES), lambda i: (i, 0, 0, 0)),
        ),
        compiler_params=pltpu.CompilerParams(
            dimension_semantics=("parallel",),
            vmem_limit_bytes=32 * 1024 * 1024),
    )(locT, loctT, fcT, fctT, priT, ct2, confT)

    loss_l = jnp.sum(partials[:, 0])
    loss_four_corners = jnp.sum(partials[:, 1])
    loss_border = jnp.sum(partials[:, 2])

    # Padding rows have ce = log(num_classes) > 0: slice down to the real M
    # entries BEFORE hard-negative mining (keep this ordering).
    ce = ce_map.reshape(-1)[:M].reshape(num, num_priors)

    # ---- hard negative mining (per-row sort has no practical Pallas path) ---
    pos = conf_t > 0
    loss_c_rank = jnp.where(pos, 0.0, ce)
    loss_idx = jnp.argsort(-loss_c_rank, axis=1)        # descending
    idx_rank = jnp.argsort(loss_idx, axis=1)
    num_pos = jnp.sum(pos.astype(jnp.int32), axis=1, keepdims=True)
    num_neg = jnp.minimum(negpos_ratio * num_pos, num_priors - 1)
    neg = idx_rank < num_neg
    loss_c = jnp.sum(jnp.where(jnp.logical_or(pos, neg), ce, 0.0))

    # TODO(synk): the original casts the final sums to float64; kept in f32.
    N = jnp.sum(num_pos).astype(f32)
    return (loss_l / N, loss_c / N, loss_four_corners / N,
            16.0 * loss_border / N)


# ---------------------------------------------------------------------------
# Pure-JAX reference mirroring the PyTorch forward (post-matching part).
# ---------------------------------------------------------------------------
def _reference(loc_data, conf_data, priors, fc_data, loc_t, conf_t, fc_t,
               variances, negpos_ratio):
    num, num_priors, _ = loc_data.shape
    v0, v1 = variances
    pos = conf_t > 0
    posf = pos.astype(jnp.float32)

    def sl1(d):
        ad = jnp.abs(d)
        return jnp.where(ad < 1.0, 0.5 * d * d, ad - 0.5)

    loss_l = jnp.sum(sl1(loc_data - loc_t) * posf[..., None])
    loss_fc = jnp.sum(sl1(fc_data - fc_t) * posf[..., None])

    pri = jnp.broadcast_to(priors[None], (num, num_priors, 4))
    cxcy = pri[..., :2] + loc_data[..., :2] * v0 * pri[..., 2:]
    wh = pri[..., 2:] * jnp.exp(loc_data[..., 2:] * v1)
    x1y1 = cxcy - wh / 2.0
    x2y2 = x1y1 + wh
    db = jnp.concatenate([x1y1, x2y2], axis=-1)

    pc = jnp.tile(pri[..., :2], (1, 1, 4))
    pwh = jnp.tile(pri[..., 2:], (1, 1, 4))
    dfp = pc + fc_data * v0 * pwh

    bl = sl1((jnp.minimum(dfp[..., 0], dfp[..., 6]) - db[..., 0]) / v0)
    bt = sl1((jnp.minimum(dfp[..., 1], dfp[..., 3]) - db[..., 1]) / v0)
    br = sl1((jnp.maximum(dfp[..., 2], dfp[..., 4]) - db[..., 2]) / v0)
    bb = sl1((jnp.maximum(dfp[..., 5], dfp[..., 7]) - db[..., 3]) / v0)
    loss_border = jnp.sum((bl + bt + br + bb) * posf)

    lse = jax.nn.logsumexp(conf_data, axis=-1)
    gathered = jnp.take_along_axis(conf_data, conf_t[..., None], axis=-1)[..., 0]
    ce = lse - gathered

    loss_c_rank = jnp.where(pos, 0.0, ce)
    loss_idx = jnp.argsort(-loss_c_rank, axis=1)
    idx_rank = jnp.argsort(loss_idx, axis=1)
    num_pos = jnp.sum(pos.astype(jnp.int32), axis=1, keepdims=True)
    num_neg = jnp.minimum(negpos_ratio * num_pos, num_priors - 1)
    neg = idx_rank < num_neg
    loss_c = jnp.sum(jnp.where(pos | neg, ce, 0.0))

    N = jnp.sum(num_pos).astype(jnp.float32)
    return (loss_l / N, loss_c / N, loss_fc / N, 16.0 * loss_border / N)


if __name__ == "__main__":
    def run_case(key, num, num_priors, num_classes, max_tile_rows=MAX_TILE_ROWS):
        ks = jax.random.split(key, 8)
        variances = (0.1, 0.2)
        negpos_ratio = 3

        loc_data = (jax.random.normal(ks[0], (num, num_priors, 4)) * 0.5).astype(jnp.float32)
        conf_data = jax.random.normal(ks[1], (num, num_priors, num_classes)).astype(jnp.float32)
        fc_data = (jax.random.normal(ks[2], (num, num_priors, 8)) * 0.5).astype(jnp.float32)

        pr_c = jax.random.uniform(ks[3], (num_priors, 2), minval=0.2, maxval=0.8)
        pr_wh = jax.random.uniform(ks[4], (num_priors, 2), minval=0.1, maxval=0.4)
        priors = jnp.concatenate([pr_c, pr_wh], axis=1).astype(jnp.float32)

        # pre-matched targets (stand-ins for match_four_corners outputs)
        loc_t = (jax.random.normal(ks[5], (num, num_priors, 4)) * 0.5).astype(jnp.float32)
        fc_t = (jax.random.normal(ks[6], (num, num_priors, 8)) * 0.5).astype(jnp.float32)
        conf_t = jax.random.randint(ks[7], (num, num_priors), 0, num_classes)
        conf_t = conf_t.at[0, 0].set(1)                                   # guarantee positives
        conf_t = conf_t.at[num - 1, num_priors // 2].set(num_classes - 1)

        got = multibox_loss_four_corners_with_border(
            loc_data, conf_data, priors, fc_data, loc_t, conf_t, fc_t,
            variances=variances, negpos_ratio=negpos_ratio,
            max_tile_rows=max_tile_rows)
        got = jax.block_until_ready(got)

        ref = _reference(loc_data, conf_data, priors, fc_data, loc_t, conf_t,
                         fc_t, variances, negpos_ratio)

        names = ("loss_l", "loss_c", "loss_four_corners", "loss_border")
        for name, a, b in zip(names, got, ref):
            a, b = float(a), float(b)
            assert abs(a - b) <= 1e-3 * max(1.0, abs(b)), (name, a, b)

    root = jax.random.PRNGKey(0)
    k1, k2, k3 = jax.random.split(root, 3)
    run_case(k1, num=2, num_priors=8, num_classes=4)                       # tiny, 1 strip
    run_case(k2, num=2, num_priors=900, num_classes=6)                     # multi-strip tile
    run_case(k3, num=2, num_priors=640, num_classes=5, max_tile_rows=8)    # multi-tile grid
    print("KERNEL_OK")
</pallas_src>

<mosaic_0001>
module attributes {stable_mosaic.version = 11 : i64} {
  func.func @_multibox_kernel(%arg0: i32, %arg1: memref<4x8x128xf32, #tpu.memory_space<vmem>>, %arg2: memref<4x8x128xf32, #tpu.memory_space<vmem>>, %arg3: memref<8x8x128xf32, #tpu.memory_space<vmem>>, %arg4: memref<8x8x128xf32, #tpu.memory_space<vmem>>, %arg5: memref<4x8x128xf32, #tpu.memory_space<vmem>>, %arg6: memref<8x128xi32, #tpu.memory_space<vmem>>, %arg7: memref<4x8x128xf32, #tpu.memory_space<vmem>>, %arg8: memref<8x128xf32, #tpu.memory_space<vmem>>, %arg9: memref<1x3x8x128xf32, #tpu.memory_space<vmem>>) attributes {dimension_semantics = [#tpu.dimension_semantics<parallel>], iteration_bounds = array<i64: 1>, scalar_prefetch = 0 : i64, scratch_operands = 0 : i64, tpu.core_type = #tpu.core_type<tc>, window_params = [{transform_indices = @transform_0, window_bounds = array<i64: 4, 8, 128>}, {transform_indices = @transform_1, window_bounds = array<i64: 4, 8, 128>}, {transform_indices = @transform_2, window_bounds = array<i64: 8, 8, 128>}, {transform_indices = @transform_3, window_bounds = array<i64: 8, 8, 128>}, {transform_indices = @transform_4, window_bounds = array<i64: 4, 8, 128>}, {transform_indices = @transform_5, window_bounds = array<i64: 8, 128>}, {transform_indices = @transform_6, window_bounds = array<i64: 4, 8, 128>}, {transform_indices = @transform_7, window_bounds = array<i64: 8, 128>}, {transform_indices = @transform_8, window_bounds = array<i64: 1, 3, 8, 128>}]} {
    %cst = arith.constant 0.000000e+00 : f32
    %0 = vector.broadcast %cst : f32 to vector<8x128xf32>
    %cst_0 = arith.constant 0.000000e+00 : f32
    %1 = vector.broadcast %cst_0 : f32 to vector<8x128xf32>
    %cst_1 = arith.constant 0.000000e+00 : f32
    %2 = vector.broadcast %cst_1 : f32 to vector<8x128xf32>
    %c0 = arith.constant 0 : index
    %c0_2 = arith.constant 0 : index
    %3 = vector.load %arg6[%c0, %c0_2] : memref<8x128xi32, #tpu.memory_space<vmem>>, vector<8x128xi32>
    %c0_i32 = arith.constant 0 : i32
    %4 = vector.broadcast %c0_i32 : i32 to vector<8x128xi32>
    %5 = arith.cmpi sgt, %3, %4 : vector<8x128xi32>
    %6 = arith.extui %5 : vector<8x128xi1> to vector<8x128xi32>
    %7 = arith.sitofp %6 : vector<8x128xi32> to vector<8x128xf32>
    %c0_3 = arith.constant 0 : index
    %c0_4 = arith.constant 0 : index
    %c0_5 = arith.constant 0 : index
    %8 = vector.load %arg1[%c0_3, %c0_4, %c0_5] : memref<4x8x128xf32, #tpu.memory_space<vmem>>, vector<1x8x128xf32>
    %9 = vector.shape_cast %8 : vector<1x8x128xf32> to vector<8x128xf32>
    %c1 = arith.constant 1 : index
    %c0_6 = arith.constant 0 : index
    %c0_7 = arith.constant 0 : index
    %10 = vector.load %arg1[%c1, %c0_6, %c0_7] : memref<4x8x128xf32, #tpu.memory_space<vmem>>, vector<1x8x128xf32>
    %11 = vector.shape_cast %10 : vector<1x8x128xf32> to vector<8x128xf32>
    %c2 = arith.constant 2 : index
    %c0_8 = arith.constant 0 : index
    %c0_9 = arith.constant 0 : index
    %12 = vector.load %arg1[%c2, %c0_8, %c0_9] : memref<4x8x128xf32, #tpu.memory_space<vmem>>, vector<1x8x128xf32>
    %13 = vector.shape_cast %12 : vector<1x8x128xf32> to vector<8x128xf32>
    %c3 = arith.constant 3 : index
    %c0_10 = arith.constant 0 : index
    %c0_11 = arith.constant 0 : index
    %14 = vector.load %arg1[%c3, %c0_10, %c0_11] : memref<4x8x128xf32, #tpu.memory_space<vmem>>, vector<1x8x128xf32>
    %15 = vector.shape_cast %14 : vector<1x8x128xf32> to vector<8x128xf32>
    %c0_12 = arith.constant 0 : index
    %c0_13 = arith.constant 0 : index
    %c0_14 = arith.constant 0 : index
    %16 = vector.load %arg2[%c0_12, %c0_13, %c0_14] : memref<4x8x128xf32, #tpu.memory_space<vmem>>, vector<1x8x128xf32>
    %17 = vector.shape_cast %16 : vector<1x8x128xf32> to vector<8x128xf32>
    %18 = arith.subf %9, %17 : vector<8x128xf32>
    %19 = math.absf %18 : vector<8x128xf32>
    %cst_15 = arith.constant 1.000000e+00 : f32
    %20 = vector.broadcast %cst_15 : f32 to vector<8x128xf32>
    %21 = arith.cmpf olt, %19, %20 : vector<8x128xf32>
    %cst_16 = arith.constant 5.000000e-01 : f32
    %22 = vector.broadcast %cst_16 : f32 to vector<8x128xf32>
    %23 = arith.mulf %22, %18 : vector<8x128xf32>
    %24 = arith.mulf %23, %18 : vector<8x128xf32>
    %cst_17 = arith.constant 5.000000e-01 : f32
    %25 = vector.broadcast %cst_17 : f32 to vector<8x128xf32>
    %26 = arith.subf %19, %25 : vector<8x128xf32>
    %27 = arith.select %21, %24, %26 : vector<8x128xi1>, vector<8x128xf32>
    %c1_18 = arith.constant 1 : index
    %c0_19 = arith.constant 0 : index
    %c0_20 = arith.constant 0 : index
    %28 = vector.load %arg2[%c1_18, %c0_19, %c0_20] : memref<4x8x128xf32, #tpu.memory_space<vmem>>, vector<1x8x128xf32>
    %29 = vector.shape_cast %28 : vector<1x8x128xf32> to vector<8x128xf32>
    %30 = arith.subf %11, %29 : vector<8x128xf32>
    %31 = math.absf %30 : vector<8x128xf32>
    %cst_21 = arith.constant 1.000000e+00 : f32
    %32 = vector.broadcast %cst_21 : f32 to vector<8x128xf32>
    %33 = arith.cmpf olt, %31, %32 : vector<8x128xf32>
    %cst_22 = arith.constant 5.000000e-01 : f32
    %34 = vector.broadcast %cst_22 : f32 to vector<8x128xf32>
    %35 = arith.mulf %34, %30 : vector<8x128xf32>
    %36 = arith.mulf %35, %30 : vector<8x128xf32>
    %cst_23 = arith.constant 5.000000e-01 : f32
    %37 = vector.broadcast %cst_23 : f32 to vector<8x128xf32>
    %38 = arith.subf %31, %37 : vector<8x128xf32>
    %39 = arith.select %33, %36, %38 : vector<8x128xi1>, vector<8x128xf32>
    %40 = arith.addf %27, %39 : vector<8x128xf32>
    %c2_24 = arith.constant 2 : index
    %c0_25 = arith.constant 0 : index
    %c0_26 = arith.constant 0 : index
    %41 = vector.load %arg2[%c2_24, %c0_25, %c0_26] : memref<4x8x128xf32, #tpu.memory_space<vmem>>, vector<1x8x128xf32>
    %42 = vector.shape_cast %41 : vector<1x8x128xf32> to vector<8x128xf32>
    %43 = arith.subf %13, %42 : vector<8x128xf32>
    %44 = math.absf %43 : vector<8x128xf32>
    %cst_27 = arith.constant 1.000000e+00 : f32
    %45 = vector.broadcast %cst_27 : f32 to vector<8x128xf32>
    %46 = arith.cmpf olt, %44, %45 : vector<8x128xf32>
    %cst_28 = arith.constant 5.000000e-01 : f32
    %47 = vector.broadcast %cst_28 : f32 to vector<8x128xf32>
    %48 = arith.mulf %47, %43 : vector<8x128xf32>
    %49 = arith.mulf %48, %43 : vector<8x128xf32>
    %cst_29 = arith.constant 5.000000e-01 : f32
    %50 = vector.broadcast %cst_29 : f32 to vector<8x128xf32>
    %51 = arith.subf %44, %50 : vector<8x128xf32>
    %52 = arith.select %46, %49, %51 : vector<8x128xi1>, vector<8x128xf32>
    %53 = arith.addf %40, %52 : vector<8x128xf32>
    %c3_30 = arith.constant 3 : index
    %c0_31 = arith.constant 0 : index
    %c0_32 = arith.constant 0 : index
    %54 = vector.load %arg2[%c3_30, %c0_31, %c0_32] : memref<4x8x128xf32, #tpu.memory_space<vmem>>, vector<1x8x128xf32>
    %55 = vector.shape_cast %54 : vector<1x8x128xf32> to vector<8x128xf32>
    %56 = arith.subf %15, %55 : vector<8x128xf32>
    %57 = math.absf %56 : vector<8x128xf32>
    %cst_33 = arith.constant 1.000000e+00 : f32
    %58 = vector.broadcast %cst_33 : f32 to vector<8x128xf32>
    %59 = arith.cmpf olt, %57, %58 : vector<8x128xf32>
    %cst_34 = arith.constant 5.000000e-01 : f32
    %60 = vector.broadcast %cst_34 : f32 to vector<8x128xf32>
    %61 = arith.mulf %60, %56 : vector<8x128xf32>
    %62 = arith.mulf %61, %56 : vector<8x128xf32>
    %cst_35 = arith.constant 5.000000e-01 : f32
    %63 = vector.broadcast %cst_35 : f32 to vector<8x128xf32>
    %64 = arith.subf %57, %63 : vector<8x128xf32>
    %65 = arith.select %59, %62, %64 : vector<8x128xi1>, vector<8x128xf32>
    %66 = arith.addf %53, %65 : vector<8x128xf32>
    %67 = arith.mulf %66, %7 : vector<8x128xf32>
    %68 = arith.addf %0, %67 : vector<8x128xf32>
    %c0_36 = arith.constant 0 : index
    %c0_37 = arith.constant 0 : index
    %c0_38 = arith.constant 0 : index
    %69 = vector.load %arg3[%c0_36, %c0_37, %c0_38] : memref<8x8x128xf32, #tpu.memory_space<vmem>>, vector<1x8x128xf32>
    %70 = vector.shape_cast %69 : vector<1x8x128xf32> to vector<8x128xf32>
    %c1_39 = arith.constant 1 : index
    %c0_40 = arith.constant 0 : index
    %c0_41 = arith.constant 0 : index
    %71 = vector.load %arg3[%c1_39, %c0_40, %c0_41] : memref<8x8x128xf32, #tpu.memory_space<vmem>>, vector<1x8x128xf32>
    %72 = vector.shape_cast %71 : vector<1x8x128xf32> to vector<8x128xf32>
    %c2_42 = arith.constant 2 : index
    %c0_43 = arith.constant 0 : index
    %c0_44 = arith.constant 0 : index
    %73 = vector.load %arg3[%c2_42, %c0_43, %c0_44] : memref<8x8x128xf32, #tpu.memory_space<vmem>>, vector<1x8x128xf32>
    %74 = vector.shape_cast %73 : vector<1x8x128xf32> to vector<8x128xf32>
    %c3_45 = arith.constant 3 : index
    %c0_46 = arith.constant 0 : index
    %c0_47 = arith.constant 0 : index
    %75 = vector.load %arg3[%c3_45, %c0_46, %c0_47] : memref<8x8x128xf32, #tpu.memory_space<vmem>>, vector<1x8x128xf32>
    %76 = vector.shape_cast %75 : vector<1x8x128xf32> to vector<8x128xf32>
    %c4 = arith.constant 4 : index
    %c0_48 = arith.constant 0 : index
    %c0_49 = arith.constant 0 : index
    %77 = vector.load %arg3[%c4, %c0_48, %c0_49] : memref<8x8x128xf32, #tpu.memory_space<vmem>>, vector<1x8x128xf32>
    %78 = vector.shape_cast %77 : vector<1x8x128xf32> to vector<8x128xf32>
    %c5 = arith.constant 5 : index
    %c0_50 = arith.constant 0 : index
    %c0_51 = arith.constant 0 : index
    %79 = vector.load %arg3[%c5, %c0_50, %c0_51] : memref<8x8x128xf32, #tpu.memory_space<vmem>>, vector<1x8x128xf32>
    %80 = vector.shape_cast %79 : vector<1x8x128xf32> to vector<8x128xf32>
    %c6 = arith.constant 6 : index
    %c0_52 = arith.constant 0 : index
    %c0_53 = arith.constant 0 : index
    %81 = vector.load %arg3[%c6, %c0_52, %c0_53] : memref<8x8x128xf32, #tpu.memory_space<vmem>>, vector<1x8x128xf32>
    %82 = vector.shape_cast %81 : vector<1x8x128xf32> to vector<8x128xf32>
    %c7 = arith.constant 7 : index
    %c0_54 = arith.constant 0 : index
    %c0_55 = arith.constant 0 : index
    %83 = vector.load %arg3[%c7, %c0_54, %c0_55] : memref<8x8x128xf32, #tpu.memory_space<vmem>>, vector<1x8x128xf32>
    %84 = vector.shape_cast %83 : vector<1x8x128xf32> to vector<8x128xf32>
    %c0_56 = arith.constant 0 : index
    %c0_57 = arith.constant 0 : index
    %c0_58 = arith.constant 0 : index
    %85 = vector.load %arg4[%c0_56, %c0_57, %c0_58] : memref<8x8x128xf32, #tpu.memory_space<vmem>>, vector<1x8x128xf32>
    %86 = vector.shape_cast %85 : vector<1x8x128xf32> to vector<8x128xf32>
    %87 = arith.subf %70, %86 : vector<8x128xf32>
    %88 = math.absf %87 : vector<8x128xf32>
    %cst_59 = arith.constant 1.000000e+00 : f32
    %89 = vector.broadcast %cst_59 : f32 to vector<8x128xf32>
    %90 = arith.cmpf olt, %88, %89 : vector<8x128xf32>
    %cst_60 = arith.constant 5.000000e-01 : f32
    %91 = vector.broadcast %cst_60 : f32 to vector<8x128xf32>
    %92 = arith.mulf %91, %87 : vector<8x128xf32>
    %93 = arith.mulf %92, %87 : vector<8x128xf32>
    %cst_61 = arith.constant 5.000000e-01 : f32
    %94 = vector.broadcast %cst_61 : f32 to vector<8x128xf32>
    %95 = arith.subf %88, %94 : vector<8x128xf32>
    %96 = arith.select %90, %93, %95 : vector<8x128xi1>, vector<8x128xf32>
    %c1_62 = arith.constant 1 : index
    %c0_63 = arith.constant 0 : index
    %c0_64 = arith.constant 0 : index
    %97 = vector.load %arg4[%c1_62, %c0_63, %c0_64] : memref<8x8x128xf32, #tpu.memory_space<vmem>>, vector<1x8x128xf32>
    %98 = vector.shape_cast %97 : vector<1x8x128xf32> to vector<8x128xf32>
    %99 = arith.subf %72, %98 : vector<8x128xf32>
    %100 = math.absf %99 : vector<8x128xf32>
    %cst_65 = arith.constant 1.000000e+00 : f32
    %101 = vector.broadcast %cst_65 : f32 to vector<8x128xf32>
    %102 = arith.cmpf olt, %100, %101 : vector<8x128xf32>
    %cst_66 = arith.constant 5.000000e-01 : f32
    %103 = vector.broadcast %cst_66 : f32 to vector<8x128xf32>
    %104 = arith.mulf %103, %99 : vector<8x128xf32>
    %105 = arith.mulf %104, %99 : vector<8x128xf32>
    %cst_67 = arith.constant 5.000000e-01 : f32
    %106 = vector.broadcast %cst_67 : f32 to vector<8x128xf32>
    %107 = arith.subf %100, %106 : vector<8x128xf32>
    %108 = arith.select %102, %105, %107 : vector<8x128xi1>, vector<8x128xf32>
    %109 = arith.addf %96, %108 : vector<8x128xf32>
    %c2_68 = arith.constant 2 : index
    %c0_69 = arith.constant 0 : index
    %c0_70 = arith.constant 0 : index
    %110 = vector.load %arg4[%c2_68, %c0_69, %c0_70] : memref<8x8x128xf32, #tpu.memory_space<vmem>>, vector<1x8x128xf32>
    %111 = vector.shape_cast %110 : vector<1x8x128xf32> to vector<8x128xf32>
    %112 = arith.subf %74, %111 : vector<8x128xf32>
    %113 = math.absf %112 : vector<8x128xf32>
    %cst_71 = arith.constant 1.000000e+00 : f32
    %114 = vector.broadcast %cst_71 : f32 to vector<8x128xf32>
    %115 = arith.cmpf olt, %113, %114 : vector<8x128xf32>
    %cst_72 = arith.constant 5.000000e-01 : f32
    %116 = vector.broadcast %cst_72 : f32 to vector<8x128xf32>
    %117 = arith.mulf %116, %112 : vector<8x128xf32>
    %118 = arith.mulf %117, %112 : vector<8x128xf32>
    %cst_73 = arith.constant 5.000000e-01 : f32
    %119 = vector.broadcast %cst_73 : f32 to vector<8x128xf32>
    %120 = arith.subf %113, %119 : vector<8x128xf32>
    %121 = arith.select %115, %118, %120 : vector<8x128xi1>, vector<8x128xf32>
    %122 = arith.addf %109, %121 : vector<8x128xf32>
    %c3_74 = arith.constant 3 : index
    %c0_75 = arith.constant 0 : index
    %c0_76 = arith.constant 0 : index
    %123 = vector.load %arg4[%c3_74, %c0_75, %c0_76] : memref<8x8x128xf32, #tpu.memory_space<vmem>>, vector<1x8x128xf32>
    %124 = vector.shape_cast %123 : vector<1x8x128xf32> to vector<8x128xf32>
    %125 = arith.subf %76, %124 : vector<8x128xf32>
    %126 = math.absf %125 : vector<8x128xf32>
    %cst_77 = arith.constant 1.000000e+00 : f32
    %127 = vector.broadcast %cst_77 : f32 to vector<8x128xf32>
    %128 = arith.cmpf olt, %126, %127 : vector<8x128xf32>
    %cst_78 = arith.constant 5.000000e-01 : f32
    %129 = vector.broadcast %cst_78 : f32 to vector<8x128xf32>
    %130 = arith.mulf %129, %125 : vector<8x128xf32>
    %131 = arith.mulf %130, %125 : vector<8x128xf32>
    %cst_79 = arith.constant 5.000000e-01 : f32
    %132 = vector.broadcast %cst_79 : f32 to vector<8x128xf32>
    %133 = arith.subf %126, %132 : vector<8x128xf32>
    %134 = arith.select %128, %131, %133 : vector<8x128xi1>, vector<8x128xf32>
    %135 = arith.addf %122, %134 : vector<8x128xf32>
    %c4_80 = arith.constant 4 : index
    %c0_81 = arith.constant 0 : index
    %c0_82 = arith.constant 0 : index
    %136 = vector.load %arg4[%c4_80, %c0_81, %c0_82] : memref<8x8x128xf32, #tpu.memory_space<vmem>>, vector<1x8x128xf32>
    %137 = vector.shape_cast %136 : vector<1x8x128xf32> to vector<8x128xf32>
    %138 = arith.subf %78, %137 : vector<8x128xf32>
    %139 = math.absf %138 : vector<8x128xf32>
    %cst_83 = arith.constant 1.000000e+00 : f32
    %140 = vector.broadcast %cst_83 : f32 to vector<8x128xf32>
    %141 = arith.cmpf olt, %139, %140 : vector<8x128xf32>
    %cst_84 = arith.constant 5.000000e-01 : f32
    %142 = vector.broadcast %cst_84 : f32 to vector<8x128xf32>
    %143 = arith.mulf %142, %138 : vector<8x128xf32>
    %144 = arith.mulf %143, %138 : vector<8x128xf32>
    %cst_85 = arith.constant 5.000000e-01 : f32
    %145 = vector.broadcast %cst_85 : f32 to vector<8x128xf32>
    %146 = arith.subf %139, %145 : vector<8x128xf32>
    %147 = arith.select %141, %144, %146 : vector<8x128xi1>, vector<8x128xf32>
    %148 = arith.addf %135, %147 : vector<8x128xf32>
    %c5_86 = arith.constant 5 : index
    %c0_87 = arith.constant 0 : index
    %c0_88 = arith.constant 0 : index
    %149 = vector.load %arg4[%c5_86, %c0_87, %c0_88] : memref<8x8x128xf32, #tpu.memory_space<vmem>>, vector<1x8x128xf32>
    %150 = vector.shape_cast %149 : vector<1x8x128xf32> to vector<8x128xf32>
    %151 = arith.subf %80, %150 : vector<8x128xf32>
    %152 = math.absf %151 : vector<8x128xf32>
    %cst_89 = arith.constant 1.000000e+00 : f32
    %153 = vector.broadcast %cst_89 : f32 to vector<8x128xf32>
    %154 = arith.cmpf olt, %152, %153 : vector<8x128xf32>
    %cst_90 = arith.constant 5.000000e-01 : f32
    %155 = vector.broadcast %cst_90 : f32 to vector<8x128xf32>
    %156 = arith.mulf %155, %151 : vector<8x128xf32>
    %157 = arith.mulf %156, %151 : vector<8x128xf32>
    %cst_91 = arith.constant 5.000000e-01 : f32
    %158 = vector.broadcast %cst_91 : f32 to vector<8x128xf32>
    %159 = arith.subf %152, %158 : vector<8x128xf32>
    %160 = arith.select %154, %157, %159 : vector<8x128xi1>, vector<8x128xf32>
    %161 = arith.addf %148, %160 : vector<8x128xf32>
    %c6_92 = arith.constant 6 : index
    %c0_93 = arith.constant 0 : index
    %c0_94 = arith.constant 0 : index
    %162 = vector.load %arg4[%c6_92, %c0_93, %c0_94] : memref<8x8x128xf32, #tpu.memory_space<vmem>>, vector<1x8x128xf32>
    %163 = vector.shape_cast %162 : vector<1x8x128xf32> to vector<8x128xf32>
    %164 = arith.subf %82, %163 : vector<8x128xf32>
    %165 = math.absf %164 : vector<8x128xf32>
    %cst_95 = arith.constant 1.000000e+00 : f32
    %166 = vector.broadcast %cst_95 : f32 to vector<8x128xf32>
    %167 = arith.cmpf olt, %165, %166 : vector<8x128xf32>
    %cst_96 = arith.constant 5.000000e-01 : f32
    %168 = vector.broadcast %cst_96 : f32 to vector<8x128xf32>
    %169 = arith.mulf %168, %164 : vector<8x128xf32>
    %170 = arith.mulf %169, %164 : vector<8x128xf32>
    %cst_97 = arith.constant 5.000000e-01 : f32
    %171 = vector.broadcast %cst_97 : f32 to vector<8x128xf32>
    %172 = arith.subf %165, %171 : vector<8x128xf32>
    %173 = arith.select %167, %170, %172 : vector<8x128xi1>, vector<8x128xf32>
    %174 = arith.addf %161, %173 : vector<8x128xf32>
    %c7_98 = arith.constant 7 : index
    %c0_99 = arith.constant 0 : index
    %c0_100 = arith.constant 0 : index
    %175 = vector.load %arg4[%c7_98, %c0_99, %c0_100] : memref<8x8x128xf32, #tpu.memory_space<vmem>>, vector<1x8x128xf32>
    %176 = vector.shape_cast %175 : vector<1x8x128xf32> to vector<8x128xf32>
    %177 = arith.subf %84, %176 : vector<8x128xf32>
    %178 = math.absf %177 : vector<8x128xf32>
    %cst_101 = arith.constant 1.000000e+00 : f32
    %179 = vector.broadcast %cst_101 : f32 to vector<8x128xf32>
    %180 = arith.cmpf olt, %178, %179 : vector<8x128xf32>
    %cst_102 = arith.constant 5.000000e-01 : f32
    %181 = vector.broadcast %cst_102 : f32 to vector<8x128xf32>
    %182 = arith.mulf %181, %177 : vector<8x128xf32>
    %183 = arith.mulf %182, %177 : vector<8x128xf32>
    %cst_103 = arith.constant 5.000000e-01 : f32
    %184 = vector.broadcast %cst_103 : f32 to vector<8x128xf32>
    %185 = arith.subf %178, %184 : vector<8x128xf32>
    %186 = arith.select %180, %183, %185 : vector<8x128xi1>, vector<8x128xf32>
    %187 = arith.addf %174, %186 : vector<8x128xf32>
    %188 = arith.mulf %187, %7 : vector<8x128xf32>
    %189 = arith.addf %1, %188 : vector<8x128xf32>
    %c0_104 = arith.constant 0 : index
    %c0_105 = arith.constant 0 : index
    %c0_106 = arith.constant 0 : index
    %190 = vector.load %arg5[%c0_104, %c0_105, %c0_106] : memref<4x8x128xf32, #tpu.memory_space<vmem>>, vector<1x8x128xf32>
    %191 = vector.shape_cast %190 : vector<1x8x128xf32> to vector<8x128xf32>
    %c1_107 = arith.constant 1 : index
    %c0_108 = arith.constant 0 : index
    %c0_109 = arith.constant 0 : index
    %192 = vector.load %arg5[%c1_107, %c0_108, %c0_109] : memref<4x8x128xf32, #tpu.memory_space<vmem>>, vector<1x8x128xf32>
    %193 = vector.shape_cast %192 : vector<1x8x128xf32> to vector<8x128xf32>
    %c2_110 = arith.constant 2 : index
    %c0_111 = arith.constant 0 : index
    %c0_112 = arith.constant 0 : index
    %194 = vector.load %arg5[%c2_110, %c0_111, %c0_112] : memref<4x8x128xf32, #tpu.memory_space<vmem>>, vector<1x8x128xf32>
    %195 = vector.shape_cast %194 : vector<1x8x128xf32> to vector<8x128xf32>
    %c3_113 = arith.constant 3 : index
    %c0_114 = arith.constant 0 : index
    %c0_115 = arith.constant 0 : index
    %196 = vector.load %arg5[%c3_113, %c0_114, %c0_115] : memref<4x8x128xf32, #tpu.memory_space<vmem>>, vector<1x8x128xf32>
    %197 = vector.shape_cast %196 : vector<1x8x128xf32> to vector<8x128xf32>
    %cst_116 = arith.constant 2.000000e-01 : f32
    %198 = vector.broadcast %cst_116 : f32 to vector<8x128xf32>
    %199 = arith.mulf %13, %198 : vector<8x128xf32>
    %200 = math.exp %199 : vector<8x128xf32>
    %201 = arith.mulf %195, %200 : vector<8x128xf32>
    %cst_117 = arith.constant 2.000000e-01 : f32
    %202 = vector.broadcast %cst_117 : f32 to vector<8x128xf32>
    %203 = arith.mulf %15, %202 : vector<8x128xf32>
    %204 = math.exp %203 : vector<8x128xf32>
    %205 = arith.mulf %197, %204 : vector<8x128xf32>
    %cst_118 = arith.constant 1.000000e-01 : f32
    %206 = vector.broadcast %cst_118 : f32 to vector<8x128xf32>
    %207 = arith.mulf %9, %206 : vector<8x128xf32>
    %208 = arith.mulf %207, %195 : vector<8x128xf32>
    %209 = arith.addf %191, %208 : vector<8x128xf32>
    %cst_119 = arith.constant 5.000000e-01 : f32
    %210 = vector.broadcast %cst_119 : f32 to vector<8x128xf32>
    %211 = arith.mulf %210, %201 : vector<8x128xf32>
    %212 = arith.subf %209, %211 : vector<8x128xf32>
    %cst_120 = arith.constant 1.000000e-01 : f32
    %213 = vector.broadcast %cst_120 : f32 to vector<8x128xf32>
    %214 = arith.mulf %11, %213 : vector<8x128xf32>
    %215 = arith.mulf %214, %197 : vector<8x128xf32>
    %216 = arith.addf %193, %215 : vector<8x128xf32>
    %cst_121 = arith.constant 5.000000e-01 : f32
    %217 = vector.broadcast %cst_121 : f32 to vector<8x128xf32>
    %218 = arith.mulf %217, %205 : vector<8x128xf32>
    %219 = arith.subf %216, %218 : vector<8x128xf32>
    %220 = arith.addf %212, %201 : vector<8x128xf32>
    %221 = arith.addf %219, %205 : vector<8x128xf32>
    %cst_122 = arith.constant 1.000000e-01 : f32
    %222 = vector.broadcast %cst_122 : f32 to vector<8x128xf32>
    %223 = arith.mulf %222, %195 : vector<8x128xf32>
    %cst_123 = arith.constant 1.000000e-01 : f32
    %224 = vector.broadcast %cst_123 : f32 to vector<8x128xf32>
    %225 = arith.mulf %224, %197 : vector<8x128xf32>
    %226 = arith.mulf %70, %223 : vector<8x128xf32>
    %227 = arith.addf %191, %226 : vector<8x128xf32>
    %228 = arith.mulf %72, %225 : vector<8x128xf32>
    %229 = arith.addf %193, %228 : vector<8x128xf32>
    %230 = arith.mulf %74, %223 : vector<8x128xf32>
    %231 = arith.addf %191, %230 : vector<8x128xf32>
    %232 = arith.mulf %76, %225 : vector<8x128xf32>
    %233 = arith.addf %193, %232 : vector<8x128xf32>
    %234 = arith.mulf %78, %223 : vector<8x128xf32>
    %235 = arith.addf %191, %234 : vector<8x128xf32>
    %236 = arith.mulf %80, %225 : vector<8x128xf32>
    %237 = arith.addf %193, %236 : vector<8x128xf32>
    %238 = arith.mulf %82, %223 : vector<8x128xf32>
    %239 = arith.addf %191, %238 : vector<8x128xf32>
    %240 = arith.mulf %84, %225 : vector<8x128xf32>
    %241 = arith.addf %193, %240 : vector<8x128xf32>
    %242 = arith.minimumf %227, %239 : vector<8x128xf32>
    %243 = arith.subf %242, %212 : vector<8x128xf32>
    %cst_124 = arith.constant 1.000000e+01 : f32
    %244 = vector.broadcast %cst_124 : f32 to vector<8x128xf32>
    %245 = arith.mulf %243, %244 : vector<8x128xf32>
    %246 = math.absf %245 : vector<8x128xf32>
    %cst_125 = arith.constant 1.000000e+00 : f32
    %247 = vector.broadcast %cst_125 : f32 to vector<8x128xf32>
    %248 = arith.cmpf olt, %246, %247 : vector<8x128xf32>
    %cst_126 = arith.constant 5.000000e-01 : f32
    %249 = vector.broadcast %cst_126 : f32 to vector<8x128xf32>
    %250 = arith.mulf %249, %245 : vector<8x128xf32>
    %251 = arith.mulf %250, %245 : vector<8x128xf32>
    %cst_127 = arith.constant 5.000000e-01 : f32
    %252 = vector.broadcast %cst_127 : f32 to vector<8x128xf32>
    %253 = arith.subf %246, %252 : vector<8x128xf32>
    %254 = arith.select %248, %251, %253 : vector<8x128xi1>, vector<8x128xf32>
    %255 = arith.minimumf %229, %233 : vector<8x128xf32>
    %256 = arith.subf %255, %219 : vector<8x128xf32>
    %cst_128 = arith.constant 1.000000e+01 : f32
    %257 = vector.broadcast %cst_128 : f32 to vector<8x128xf32>
    %258 = arith.mulf %256, %257 : vector<8x128xf32>
    %259 = math.absf %258 : vector<8x128xf32>
    %cst_129 = arith.constant 1.000000e+00 : f32
    %260 = vector.broadcast %cst_129 : f32 to vector<8x128xf32>
    %261 = arith.cmpf olt, %259, %260 : vector<8x128xf32>
    %cst_130 = arith.constant 5.000000e-01 : f32
    %262 = vector.broadcast %cst_130 : f32 to vector<8x128xf32>
    %263 = arith.mulf %262, %258 : vector<8x128xf32>
    %264 = arith.mulf %263, %258 : vector<8x128xf32>
    %cst_131 = arith.constant 5.000000e-01 : f32
    %265 = vector.broadcast %cst_131 : f32 to vector<8x128xf32>
    %266 = arith.subf %259, %265 : vector<8x128xf32>
    %267 = arith.select %261, %264, %266 : vector<8x128xi1>, vector<8x128xf32>
    %268 = arith.addf %254, %267 : vector<8x128xf32>
    %269 = arith.maximumf %231, %235 : vector<8x128xf32>
    %270 = arith.subf %269, %220 : vector<8x128xf32>
    %cst_132 = arith.constant 1.000000e+01 : f32
    %271 = vector.broadcast %cst_132 : f32 to vector<8x128xf32>
    %272 = arith.mulf %270, %271 : vector<8x128xf32>
    %273 = math.absf %272 : vector<8x128xf32>
    %cst_133 = arith.constant 1.000000e+00 : f32
    %274 = vector.broadcast %cst_133 : f32 to vector<8x128xf32>
    %275 = arith.cmpf olt, %273, %274 : vector<8x128xf32>
    %cst_134 = arith.constant 5.000000e-01 : f32
    %276 = vector.broadcast %cst_134 : f32 to vector<8x128xf32>
    %277 = arith.mulf %276, %272 : vector<8x128xf32>
    %278 = arith.mulf %277, %272 : vector<8x128xf32>
    %cst_135 = arith.constant 5.000000e-01 : f32
    %279 = vector.broadcast %cst_135 : f32 to vector<8x128xf32>
    %280 = arith.subf %273, %279 : vector<8x128xf32>
    %281 = arith.select %275, %278, %280 : vector<8x128xi1>, vector<8x128xf32>
    %282 = arith.addf %268, %281 : vector<8x128xf32>
    %283 = arith.maximumf %237, %241 : vector<8x128xf32>
    %284 = arith.subf %283, %221 : vector<8x128xf32>
    %cst_136 = arith.constant 1.000000e+01 : f32
    %285 = vector.broadcast %cst_136 : f32 to vector<8x128xf32>
    %286 = arith.mulf %284, %285 : vector<8x128xf32>
    %287 = math.absf %286 : vector<8x128xf32>
    %cst_137 = arith.constant 1.000000e+00 : f32
    %288 = vector.broadcast %cst_137 : f32 to vector<8x128xf32>
    %289 = arith.cmpf olt, %287, %288 : vector<8x128xf32>
    %cst_138 = arith.constant 5.000000e-01 : f32
    %290 = vector.broadcast %cst_138 : f32 to vector<8x128xf32>
    %291 = arith.mulf %290, %286 : vector<8x128xf32>
    %292 = arith.mulf %291, %286 : vector<8x128xf32>
    %cst_139 = arith.constant 5.000000e-01 : f32
    %293 = vector.broadcast %cst_139 : f32 to vector<8x128xf32>
    %294 = arith.subf %287, %293 : vector<8x128xf32>
    %295 = arith.select %289, %292, %294 : vector<8x128xi1>, vector<8x128xf32>
    %296 = arith.addf %282, %295 : vector<8x128xf32>
    %297 = arith.mulf %296, %7 : vector<8x128xf32>
    %298 = arith.addf %2, %297 : vector<8x128xf32>
    %c0_140 = arith.constant 0 : index
    %c0_141 = arith.constant 0 : index
    %c0_142 = arith.constant 0 : index
    %299 = vector.load %arg7[%c0_140, %c0_141, %c0_142] : memref<4x8x128xf32, #tpu.memory_space<vmem>>, vector<1x8x128xf32>
    %300 = vector.shape_cast %299 : vector<1x8x128xf32> to vector<8x128xf32>
    %c1_143 = arith.constant 1 : index
    %c0_144 = arith.constant 0 : index
    %c0_145 = arith.constant 0 : index
    %301 = vector.load %arg7[%c1_143, %c0_144, %c0_145] : memref<4x8x128xf32, #tpu.memory_space<vmem>>, vector<1x8x128xf32>
    %302 = vector.shape_cast %301 : vector<1x8x128xf32> to vector<8x128xf32>
    %303 = arith.maximumf %300, %302 : vector<8x128xf32>
    %c2_146 = arith.constant 2 : index
    %c0_147 = arith.constant 0 : index
    %c0_148 = arith.constant 0 : index
    %304 = vector.load %arg7[%c2_146, %c0_147, %c0_148] : memref<4x8x128xf32, #tpu.memory_space<vmem>>, vector<1x8x128xf32>
    %305 = vector.shape_cast %304 : vector<1x8x128xf32> to vector<8x128xf32>
    %306 = arith.maximumf %303, %305 : vector<8x128xf32>
    %c3_149 = arith.constant 3 : index
    %c0_150 = arith.constant 0 : index
    %c0_151 = arith.constant 0 : index
    %307 = vector.load %arg7[%c3_149, %c0_150, %c0_151] : memref<4x8x128xf32, #tpu.memory_space<vmem>>, vector<1x8x128xf32>
    %308 = vector.shape_cast %307 : vector<1x8x128xf32> to vector<8x128xf32>
    %309 = arith.maximumf %306, %308 : vector<8x128xf32>
    %310 = arith.subf %300, %309 : vector<8x128xf32>
    %311 = math.exp %310 : vector<8x128xf32>
    %c0_i32_152 = arith.constant 0 : i32
    %312 = vector.broadcast %c0_i32_152 : i32 to vector<8x128xi32>
    %313 = arith.cmpi eq, %3, %312 : vector<8x128xi32>
    %cst_153 = arith.constant 0.000000e+00 : f32
    %314 = vector.broadcast %cst_153 : f32 to vector<8x128xf32>
    %315 = arith.select %313, %300, %314 : vector<8x128xi1>, vector<8x128xf32>
    %c1_154 = arith.constant 1 : index
    %c0_155 = arith.constant 0 : index
    %c0_156 = arith.constant 0 : index
    %316 = vector.load %arg7[%c1_154, %c0_155, %c0_156] : memref<4x8x128xf32, #tpu.memory_space<vmem>>, vector<1x8x128xf32>
    %317 = vector.shape_cast %316 : vector<1x8x128xf32> to vector<8x128xf32>
    %318 = arith.subf %317, %309 : vector<8x128xf32>
    %319 = math.exp %318 : vector<8x128xf32>
    %320 = arith.addf %311, %319 : vector<8x128xf32>
    %c1_i32 = arith.constant 1 : i32
    %321 = vector.broadcast %c1_i32 : i32 to vector<8x128xi32>
    %322 = arith.cmpi eq, %3, %321 : vector<8x128xi32>
    %cst_157 = arith.constant 0.000000e+00 : f32
    %323 = vector.broadcast %cst_157 : f32 to vector<8x128xf32>
    %324 = arith.select %322, %317, %323 : vector<8x128xi1>, vector<8x128xf32>
    %325 = arith.addf %315, %324 : vector<8x128xf32>
    %c2_158 = arith.constant 2 : index
    %c0_159 = arith.constant 0 : index
    %c0_160 = arith.constant 0 : index
    %326 = vector.load %arg7[%c2_158, %c0_159, %c0_160] : memref<4x8x128xf32, #tpu.memory_space<vmem>>, vector<1x8x128xf32>
    %327 = vector.shape_cast %326 : vector<1x8x128xf32> to vector<8x128xf32>
    %328 = arith.subf %327, %309 : vector<8x128xf32>
    %329 = math.exp %328 : vector<8x128xf32>
    %330 = arith.addf %320, %329 : vector<8x128xf32>
    %c2_i32 = arith.constant 2 : i32
    %331 = vector.broadcast %c2_i32 : i32 to vector<8x128xi32>
    %332 = arith.cmpi eq, %3, %331 : vector<8x128xi32>
    %cst_161 = arith.constant 0.000000e+00 : f32
    %333 = vector.broadcast %cst_161 : f32 to vector<8x128xf32>
    %334 = arith.select %332, %327, %333 : vector<8x128xi1>, vector<8x128xf32>
    %335 = arith.addf %325, %334 : vector<8x128xf32>
    %c3_162 = arith.constant 3 : index
    %c0_163 = arith.constant 0 : index
    %c0_164 = arith.constant 0 : index
    %336 = vector.load %arg7[%c3_162, %c0_163, %c0_164] : memref<4x8x128xf32, #tpu.memory_space<vmem>>, vector<1x8x128xf32>
    %337 = vector.shape_cast %336 : vector<1x8x128xf32> to vector<8x128xf32>
    %338 = arith.subf %337, %309 : vector<8x128xf32>
    %339 = math.exp %338 : vector<8x128xf32>
    %340 = arith.addf %330, %339 : vector<8x128xf32>
    %c3_i32 = arith.constant 3 : i32
    %341 = vector.broadcast %c3_i32 : i32 to vector<8x128xi32>
    %342 = arith.cmpi eq, %3, %341 : vector<8x128xi32>
    %cst_165 = arith.constant 0.000000e+00 : f32
    %343 = vector.broadcast %cst_165 : f32 to vector<8x128xf32>
    %344 = arith.select %342, %337, %343 : vector<8x128xi1>, vector<8x128xf32>
    %345 = arith.addf %335, %344 : vector<8x128xf32>
    %346 = math.log %340 : vector<8x128xf32>
    %347 = arith.addf %309, %346 : vector<8x128xf32>
    %348 = arith.subf %347, %345 : vector<8x128xf32>
    %c0_166 = arith.constant 0 : index
    %c0_167 = arith.constant 0 : index
    %349 = vector.load %arg8[%c0_166, %c0_167] : memref<8x128xf32, #tpu.memory_space<vmem>>, vector<8x128xf32>
    tpu.vector_store %arg8[%c0_166, %c0_167], %348 {strides = array<i32>} : memref<8x128xf32, #tpu.memory_space<vmem>>, vector<8x128xf32>,
    %c0_168 = arith.constant 0 : index
    %c0_169 = arith.constant 0 : index
    %c0_170 = arith.constant 0 : index
    %c0_171 = arith.constant 0 : index
    %350 = vector.load %arg9[%c0_168, %c0_169, %c0_170, %c0_171] : memref<1x3x8x128xf32, #tpu.memory_space<vmem>>, vector<1x1x8x128xf32>
    %351 = vector.shape_cast %350 : vector<1x1x8x128xf32> to vector<8x128xf32>
    %352 = vector.shape_cast %68 : vector<8x128xf32> to vector<1x1x8x128xf32>
    tpu.vector_store %arg9[%c0_168, %c0_169, %c0_170, %c0_171], %352 {strides = array<i32>} : memref<1x3x8x128xf32, #tpu.memory_space<vmem>>, vector<1x1x8x128xf32>,
    %c0_172 = arith.constant 0 : index
    %c1_173 = arith.constant 1 : index
    %c0_174 = arith.constant 0 : index
    %c0_175 = arith.constant 0 : index
    %353 = vector.load %arg9[%c0_172, %c1_173, %c0_174, %c0_175] : memref<1x3x8x128xf32, #tpu.memory_space<vmem>>, vector<1x1x8x128xf32>
    %354 = vector.shape_cast %353 : vector<1x1x8x128xf32> to vector<8x128xf32>
    %355 = vector.shape_cast %189 : vector<8x128xf32> to vector<1x1x8x128xf32>
    tpu.vector_store %arg9[%c0_172, %c1_173, %c0_174, %c0_175], %355 {strides = array<i32>} : memref<1x3x8x128xf32, #tpu.memory_space<vmem>>, vector<1x1x8x128xf32>,
    %c0_176 = arith.constant 0 : index
    %c2_177 = arith.constant 2 : index
    %c0_178 = arith.constant 0 : index
    %c0_179 = arith.constant 0 : index
    %356 = vector.load %arg9[%c0_176, %c2_177, %c0_178, %c0_179] : memref<1x3x8x128xf32, #tpu.memory_space<vmem>>, vector<1x1x8x128xf32>
    %357 = vector.shape_cast %356 : vector<1x1x8x128xf32> to vector<8x128xf32>
    %358 = vector.shape_cast %298 : vector<8x128xf32> to vector<1x1x8x128xf32>
    tpu.vector_store %arg9[%c0_176, %c2_177, %c0_178, %c0_179], %358 {strides = array<i32>} : memref<1x3x8x128xf32, #tpu.memory_space<vmem>>, vector<1x1x8x128xf32>,
    return
  }
  func.func @transform_0(%arg0: i32) -> (i32, i32, i32) {
    %c0_i32 = arith.constant 0 : i32
    %c0_i32_0 = arith.constant 0 : i32
    %c0_i32_1 = arith.constant 0 : i32
    return %c0_i32, %arg0, %c0_i32_0 : i32, i32, i32
  }
  func.func @transform_1(%arg0: i32) -> (i32, i32, i32) {
    %c0_i32 = arith.constant 0 : i32
    %c0_i32_0 = arith.constant 0 : i32
    %c0_i32_1 = arith.constant 0 : i32
    return %c0_i32, %arg0, %c0_i32_0 : i32, i32, i32
  }
  func.func @transform_2(%arg0: i32) -> (i32, i32, i32) {
    %c0_i32 = arith.constant 0 : i32
    %c0_i32_0 = arith.constant 0 : i32
    %c0_i32_1 = arith.constant 0 : i32
    return %c0_i32, %arg0, %c0_i32_0 : i32, i32, i32
  }
  func.func @transform_3(%arg0: i32) -> (i32, i32, i32) {
    %c0_i32 = arith.constant 0 : i32
    %c0_i32_0 = arith.constant 0 : i32
    %c0_i32_1 = arith.constant 0 : i32
    return %c0_i32, %arg0, %c0_i32_0 : i32, i32, i32
  }
  func.func @transform_4(%arg0: i32) -> (i32, i32, i32) {
    %c0_i32 = arith.constant 0 : i32
    %c0_i32_0 = arith.constant 0 : i32
    %c0_i32_1 = arith.constant 0 : i32
    return %c0_i32, %arg0, %c0_i32_0 : i32, i32, i32
  }
  func.func @transform_5(%arg0: i32) -> (i32, i32) {
    %c0_i32 = arith.constant 0 : i32
    %c0_i32_0 = arith.constant 0 : i32
    return %arg0, %c0_i32 : i32, i32
  }
  func.func @transform_6(%arg0: i32) -> (i32, i32, i32) {
    %c0_i32 = arith.constant 0 : i32
    %c0_i32_0 = arith.constant 0 : i32
    %c0_i32_1 = arith.constant 0 : i32
    return %c0_i32, %arg0, %c0_i32_0 : i32, i32, i32
  }
  func.func @transform_7(%arg0: i32) -> (i32, i32) {
    %c0_i32 = arith.constant 0 : i32
    %c0_i32_0 = arith.constant 0 : i32
    return %arg0, %c0_i32 : i32, i32
  }
  func.func @transform_8(%arg0: i32) -> (i32, i32, i32, i32) {
    %c0_i32 = arith.constant 0 : i32
    %c0_i32_0 = arith.constant 0 : i32
    %c0_i32_1 = arith.constant 0 : i32
    %c0_i32_2 = arith.constant 0 : i32
    return %arg0, %c0_i32, %c0_i32_0, %c0_i32_1 : i32, i32, i32, i32
  }
}

</mosaic_0001>

<bundles_post_ra>
// kernel: tpu_custom_call.1
= control target key start
LH: loop header
LB: loop body
LE: loop exit
PB: predicated region body
PF: predicated region fallthrough
CT: control target
= control target key end

     0   :  { %14 = vsyncpa [#allocation3], 0  ;;  %s957_s0 = inlined_call_operand.hbm [shape: f32[4,8,128], index: 0, kind: input, shape index: {}]   ;;  %s958_s1 = inlined_call_operand.hbm [shape: f32[4,8,128], index: 1, kind: input, shape index: {}]   ;;  %s959_s2 = inlined_call_operand.hbm [shape: f32[8,8,128], index: 2, kind: input, shape index: {}]   ;;  %s960_s3 = inlined_call_operand.hbm [shape: f32[8,8,128], index: 3, kind: input, shape index: {}]   ;;  %s961_s4 = inlined_call_operand.hbm [shape: f32[4,8,128], index: 4, kind: input, shape index: {}]   ;;  %s962_s5 = inlined_call_operand.vmem [shape: s32[8,128], index: 5, kind: input, shape index: {}]   ;;  %s963_s6 = inlined_call_operand.hbm [shape: f32[4,8,128], index: 6, kind: input, shape index: {}]   ;;  %s964_s7 = inlined_call_operand.hbm [shape: f32[8,128], index: 7, kind: output, shape index: {0}]   ;;  %s965_s8 = inlined_call_operand.hbm [shape: f32[1,3,8,128], index: 8, kind: output, shape index: {1}]  }
   0x1   :  { %15 = vsyncpa [#allocation6], 0 }
   0x2   :  { %16 = vsyncpa [#allocation9], 0 }
   0x3   :  { %17 = vsyncpa [#allocation12], 0 }
   0x4   :  { %18 = vsyncpa [#allocation4], 0 }
   0x5   :  { %19 = vsyncpa [#allocation15], 0  ;;  %s654_s27 = smov [#allocation5]   ;;  %s655_s29 = smov [#allocation8]  }
   0x6   :  { %s37_s28 = sshll.u32 %s654_s27, 4  ;;  %s61_s30 = sshll.u32 %s655_s29, 4  ;;  %s38_s28 = int_to_ptr.vmem [resolvable:$true] %s37_s28  ;;  %s710_s30 = int_to_ptr.vmem [resolvable:$true] %s61_s30 }
   0x7   :  { %s466_s11 = scalar_lea.hbm %s958_s1, 512 }
   0x8   :  { %p467_p0 = scmp.ne.s32.totalorder %s958_s1, %s466_s11  ;;  %p470_p1 = scmp.lt.u32.totalorder %s466_s11, %s958_s1 }
   0xa   :  { %p472_p2 = pnand %p470_p1, %p467_p0 }
   0xc   :  { %475 = shalt.err (!%p472_p2)
}
   0xd   :  { %s476_s16 = scalar_lea.vmem %s38_s28, 512  ;;  %p481_p4 = scmp.lt.s32.totalorder %s38_s28, %s38_s28 }
   0xe   :  { %p477_p3 = scmp.ne.s32.totalorder %s38_s28, %s476_s16  ;;  %p482_p5 = scmp.lt.s32.totalorder %s476_s16, %s476_s16 }
  0x10   :  { %p483_p6 = por %p482_p5, %p481_p4 }
  0x12   :  { %p484_p7 = pnand %p483_p6, %p477_p3 }
  0x14   :  { %487 = shalt.err (!%p484_p7)
}
  0x15   :  { %s656_s17 = smov 128   ;;  %s657_s18 = smov 8  }
  0x16   :  { %43 = dma.hbm_to_vmem [thread:$0]  %s958_s1, 512, %s38_s28, [#allocation6], %s656_s17, %s656_s17, %s657_s18  }
  0x17   :  { %s488_s23 = scalar_lea.hbm %s960_s3, 1024 }
  0x18   :  { %p489_p8 = scmp.ne.s32.totalorder %s960_s3, %s488_s23  ;;  %p492_p9 = scmp.lt.u32.totalorder %s488_s23, %s960_s3 }
  0x1a   :  { %p494_p10 = pnand %p492_p9, %p489_p8 }
  0x1c   :  { %497 = shalt.err (!%p494_p10)
}
  0x1d   :  { %s498_s29 = scalar_lea.vmem %s710_s30, 1024  ;;  %p503_p12 = scmp.lt.s32.totalorder %s710_s30, %s710_s30 }
  0x1e   :  { %p499_p11 = scmp.ne.s32.totalorder %s710_s30, %s498_s29  ;;  %p504_p13 = scmp.lt.s32.totalorder %s498_s29, %s498_s29 }
  0x20   :  { %p505_p0 = por %p504_p13, %p503_p12 }
  0x22   :  { %p506_p1 = pnand %p505_p0, %p499_p11 }
  0x24   :  { %509 = shalt.err (!%p506_p1)
}
  0x25   :  { %67 = dma.hbm_to_vmem [thread:$0]  %s960_s3, 1024, %s710_s30, [#allocation9], %s656_s17, %s656_s17, %s657_s18  }
  0x26   :  { %s658_s9 = smov [#allocation2]   ;;  %s659_s11 = smov [#allocation7]  }
  0x27   :  { %s25_s10 = sshll.u32 %s658_s9, 4  ;;  %s49_s12 = sshll.u32 %s659_s11, 4  ;;  %s26_s10 = int_to_ptr.vmem [resolvable:$true] %s25_s10  ;;  %s747_s12 = int_to_ptr.vmem [resolvable:$true] %s49_s12 }
  0x28   :  { %s510_s15 = scalar_lea.hbm %s957_s0, 512 }
  0x29   :  { %p511_p2 = scmp.ne.s32.totalorder %s957_s0, %s510_s15  ;;  %p514_p3 = scmp.lt.u32.totalorder %s510_s15, %s957_s0 }
  0x2b   :  { %p516_p4 = pnand %p514_p3, %p511_p2 }
  0x2d   :  { %519 = shalt.err (!%p516_p4)
}
  0x2e   :  { %s520_s3 = scalar_lea.vmem %s26_s10, 512  ;;  %p525_p6 = scmp.lt.s32.totalorder %s26_s10, %s26_s10 }
  0x2f   :  { %p521_p5 = scmp.ne.s32.totalorder %s26_s10, %s520_s3  ;;  %p526_p7 = scmp.lt.s32.totalorder %s520_s3, %s520_s3 }
  0x31   :  { %p527_p8 = por %p526_p7, %p525_p6 }
  0x33   :  { %p528_p9 = pnand %p527_p8, %p521_p5 }
  0x35   :  { %531 = shalt.err (!%p528_p9)
}
  0x36   :  { %31 = dma.hbm_to_vmem [thread:$0]  %s957_s0, 512, %s26_s10, [#allocation3], %s656_s17, %s656_s17, %s657_s18  }
  0x37   :  { %s532_s25 = scalar_lea.hbm %s959_s2, 1024 }
  0x38   :  { %p533_p10 = scmp.ne.s32.totalorder %s959_s2, %s532_s25  ;;  %p536_p11 = scmp.lt.u32.totalorder %s532_s25, %s959_s2 }
  0x3a   :  { %p538_p12 = pnand %p536_p11, %p533_p10 }
  0x3c   :  { %541 = shalt.err (!%p538_p12)
}
  0x3d   :  { %s542_s28 = scalar_lea.vmem %s747_s12, 1024  ;;  %p547_p0 = scmp.lt.s32.totalorder %s747_s12, %s747_s12 }
  0x3e   :  { %p543_p13 = scmp.ne.s32.totalorder %s747_s12, %s542_s28  ;;  %p548_p1 = scmp.lt.s32.totalorder %s542_s28, %s542_s28 }
  0x40   :  { %p549_p2 = por %p548_p1, %p547_p0 }
  0x42   :  { %p550_p3 = pnand %p549_p2, %p543_p13 }
  0x44   :  { %553 = shalt.err (!%p550_p3)
}
  0x45   :  { %55 = dma.hbm_to_vmem [thread:$0]  %s959_s2, 1024, %s747_s12, [#allocation6], %s656_s17, %s656_s17, %s657_s18  }
  0x46   :  { %s660_s10 = smov [#allocation10]   ;;  %s661_s13 = smov [#allocation11]  }
  0x47   :  { %s73_s11 = sshll.u32 %s660_s10, 4  ;;  %s87_s14 = sshll.u32 %s661_s13, 4  ;;  %s74_s11 = int_to_ptr.vmem [resolvable:$true] %s73_s11  ;;  %s784_s14 = int_to_ptr.vmem [resolvable:$true] %s87_s14 }
  0x48   :  { %s554_s19 = scalar_lea.hbm %s961_s4, 512 }
  0x49   :  { %p555_p4 = scmp.ne.s32.totalorder %s961_s4, %s554_s19  ;;  %p558_p5 = scmp.lt.u32.totalorder %s554_s19, %s961_s4 }
  0x4b   :  { %p560_p6 = pnand %p558_p5, %p555_p4 }
  0x4d   :  { %563 = shalt.err (!%p560_p6)
}
  0x4e   :  { %s564_s2 = scalar_lea.vmem %s74_s11, 512  ;;  %p569_p8 = scmp.lt.s32.totalorder %s74_s11, %s74_s11 }
  0x4f   :  { %p565_p7 = scmp.ne.s32.totalorder %s74_s11, %s564_s2  ;;  %p570_p9 = scmp.lt.s32.totalorder %s564_s2, %s564_s2 }
  0x51   :  { %p571_p10 = por %p570_p9, %p569_p8 }
  0x53   :  { %p572_p11 = pnand %p571_p10, %p565_p7 }
  0x55   :  { %575 = shalt.err (!%p572_p11)
}
  0x56   :  { %79 = dma.hbm_to_vmem [thread:$0]  %s961_s4, 512, %s74_s11, [#allocation9], %s656_s17, %s656_s17, %s657_s18  }
  0x57   :  { %s576_s25 = scalar_lea.hbm %s963_s6, 512 }
  0x58   :  { %p577_p12 = scmp.ne.s32.totalorder %s963_s6, %s576_s25  ;;  %p580_p13 = scmp.lt.u32.totalorder %s576_s25, %s963_s6 }
  0x5a   :  { %p582_p0 = pnand %p580_p13, %p577_p12 }
  0x5c   :  { %585 = shalt.err (!%p582_p0)
}
  0x5d   :  { %s586_s28 = scalar_lea.vmem %s784_s14, 512  ;;  %p591_p2 = scmp.lt.s32.totalorder %s784_s14, %s784_s14 }
  0x5e   :  { %p587_p1 = scmp.ne.s32.totalorder %s784_s14, %s586_s28  ;;  %p592_p3 = scmp.lt.s32.totalorder %s586_s28, %s586_s28 }
  0x60   :  { %p593_p4 = por %p592_p3, %p591_p2 }
  0x62   :  { %p594_p5 = pnand %p593_p4, %p587_p1 }
  0x64   :  { %597 = shalt.err (!%p594_p5)
}
  0x65   :  { %93 = dma.hbm_to_vmem [thread:$0]  %s963_s6, 512, %s784_s14, [#allocation12], %s656_s17, %s656_s17, %s657_s18  }
  0x66   :  { %642 = dma.done.wait [#allocation3], 512  }
  0x67   :  { %643 = vsyncadd [#allocation3], 4294966784 }
  0x68   :  { %644 = dma.done.wait [#allocation6], 1536  }
  0x69   :  { %645 = vsyncadd [#allocation6], 4294965760 }
  0x6a   :  { %646 = dma.done.wait [#allocation9], 1536  }
  0x6b   :  { %647 = vsyncadd [#allocation9], 4294965760 }
  0x6c   :  { %648 = dma.done.wait [#allocation12], 512  }
  0x6d   :  { %649 = vsyncadd [#allocation12], 4294966784  ;;  %v112_v0 = vld [vmem:[%s962_s5] sm:$0xff]  ;;  %v346_v2 = vld [vmem:[#allocation11 + $0x8] sm:$0xff]  ;;  %v662_v17 = vmov 0.0   ;;  %s663_s5 = smov [#allocation13]  }
  0x6e   :  { %v344_v1 = vld [vmem:[#allocation11] sm:$0xff]  ;;  %v349_v4 = vld [vmem:[#allocation11 + $0x10] sm:$0xff]  ;;  %v352_v5 = vld [vmem:[#allocation11 + $0x18] sm:$0xff]  ;;  %vm357_vm0 = vcmp.eq.s32.totalorder %v112_v0, 0  ;;  %vm363_vm1 = vcmp.eq.s32.totalorder %v112_v0, 1  ;;  %vm370_vm2 = vcmp.eq.s32.totalorder %v112_v0, 2 }
  0x6f   :  { %v347_v3 = vmax.f32 %v344_v1, %v346_v2  ;;  %v358_v6 = vsel %vm357_vm0, %v344_v1, 0.0  ;;  %v364_v7 = vsel %vm363_vm1, %v346_v2, 0.0  ;;  %v371_v8 = vsel %vm370_vm2, %v349_v4, 0.0  ;;  %v824_v9 = vld [vmem:[#allocation2] sm:$0xff]  ;;  %v120_v10 = vld [vmem:[#allocation2 + $0x10] sm:$0xff]  ;;  %v118_v14 = vld [vmem:[#allocation2 + $0x8] sm:$0xff] }
  0x70   :  { %vm377_vm3 = vcmp.eq.s32.totalorder %v112_v0, 3  ;;  %v365_v12 = vadd.f32 %v364_v7, %v358_v6  ;;  %vm113_vm4 = vcmp.gt.s32.totalorder %v112_v0, 0  ;;  %v123_v15 = vld [vmem:[#allocation5] sm:$0xff]  ;;  %v132_v16 = vld [vmem:[#allocation5 + $0x8] sm:$0xff]  ;;  %v122_v19 = vld [vmem:[#allocation2 + $0x18] sm:$0xff]  ;;  %s396_s6 = sshll.u32 %s663_s5, 4  ;;  %s397_s6 = int_to_ptr.vmem [resolvable:$true] %s396_s6 }
  0x71   :  { %v350_v11 = vmax.f32 %v347_v3, %v349_v4  ;;  %v378_v13 = vsel %vm377_vm3, %v352_v5, 0.0  ;;  %v826_v18 = vsel %vm113_vm4, 1.0, %v662_v17  ;;  %v124_v20 = vsub.f32 %v824_v9, %v123_v15  ;;  %v142_v22 = vld [vmem:[#allocation5 + $0x10] sm:$0xff]  ;;  %v152_v23 = vld [vmem:[#allocation5 + $0x18] sm:$0xff]  ;;  %v843_v54 = vld [vmem:[#allocation7] sm:$0xff]  ;;  %s598_s11 = scalar_lea.vmem %s397_s6, 128  ;;  %p603_p7 = scmp.lt.s32.totalorder %s397_s6, %s397_s6 }
  0x72   :  { %v133_v21 = vsub.f32 %v118_v14, %v132_v16  ;;  %v265_v24 = vmul.f32 0.2, %v120_v10  ;;  %v372_v26 = vadd.f32 %v371_v8, %v365_v12  ;;  %v143_v27 = vsub.f32 %v120_v10, %v142_v22  ;;  %v849_v58 = vld [vmem:[#allocation7 + $0x8] sm:$0xff]  ;;  %v178_v59 = vld [vmem:[#allocation8] sm:$0xff]  ;;  %v862_v6 = vld [vmem:[#allocation7 + $0x10] sm:$0xff]  ;;  %p599_p6 = scmp.ne.s32.totalorder %s397_s6, %s598_s11  ;;  %p604_p8 = scmp.lt.s32.totalorder %s598_s11, %s598_s11 }
  0x73   :  { %v829_v25 = vmax.f32 %v350_v11, %v352_v5  ;;  %v153_v28 = vsub.f32 %v122_v19, %v152_v23  ;;  %v125_v29 = vand.u32 2147483647, %v124_v20  ;;  %v127_v30 = vmul.f32 0.5, %v124_v20  ;;  %v187_v60 = vld [vmem:[#allocation8 + $0x8] sm:$0xff]  ;;  %v197_v10 = vld [vmem:[#allocation8 + $0x10] sm:$0xff]  ;;  %v207_v11 = vld [vmem:[#allocation8 + $0x18] sm:$0xff] }
  0x74   :  { %v134_v31 = vand.u32 2147483647, %v133_v21  ;;  %v136_v32 = vmul.f32 0.5, %v133_v21  ;;  %v835_v37 = vadd.f32 %v378_v13, %v372_v26  ;;  %v144_v48 = vand.u32 2147483647, %v143_v27  ;;  %v871_v16 = vld [vmem:[#allocation7 + $0x18] sm:$0xff]  ;;  %p605_p9 = por %p604_p8, %p603_p7 }
  0x75   :  { %v354_v33 = vsub.f32 %v344_v1, %v829_v25  ;;  %v359_v34 = vsub.f32 %v346_v2, %v829_v25  ;;  %v366_v35 = vsub.f32 %v349_v4, %v829_v25  ;;  %v373_v36 = vsub.f32 %v352_v5, %v829_v25  ;;  %v855_v1 = vld [vmem:[#allocation10 + $0x10] sm:$0xff] }
  0x76   :  { %vm837_vm5 = vcmp.lt.f32.partialorder %v125_v29, 1.0  ;;  %v128_v39 = vmul.f32 %v127_v30, %v124_v20  ;;  %v425_v40 = vadd.f32 -0.5, %v125_v29  ;;  %v137_v44 = vmul.f32 %v136_v32, %v133_v21  ;;  %p606_p10 = pnand %p605_p9, %p599_p6 }
  0x77   :  { %v355_v41 = vmul.f32 1.442695, %v354_v33  ;;  %v360_v42 = vmul.f32 1.442695, %v359_v34  ;;  %v367_v43 = vmul.f32 1.442695, %v366_v35  ;;  %v179_v7 = vsub.f32 %v843_v54, %v178_v59 }
  0x78   :  { %v374_v45 = vmul.f32 1.442695, %v373_v36  ;;  %v130_v46 = vsel %vm837_vm5, %v128_v39, %v425_v40  ;;  %vm135_vm6 = vcmp.lt.f32.partialorder %v134_v31, 1.0  ;;  %v426_v47 = vadd.f32 -0.5, %v134_v31  ;;  %v217_v40 = vld [vmem:[#allocation8 + $0x20] sm:$0xff] }
  0x79   :  { %452 = vpow2.f32 %v355_v41  ;;  %v146_v49 = vmul.f32 0.5, %v143_v27  ;;  %v154_v50 = vand.u32 2147483647, %v153_v28  ;;  %v156_v52 = vmul.f32 0.5, %v153_v28  ;;  %v227_v41 = vld [vmem:[#allocation8 + $0x28] sm:$0xff] }
  0x7a   :  { %454 = vpow2.f32 %v360_v42  ;;  %v139_v51 = vsel %vm135_vm6, %v137_v44, %v426_v47  ;;  %v266_v53 = vmul.f32 1.442695, %v265_v24  ;;  %vm845_vm7 = vcmp.lt.f32.partialorder %v144_v48, 1.0  ;;  %v237_v47 = vld [vmem:[#allocation8 + $0x30] sm:$0xff] }
  0x7b   :  { %456 = vpow2.f32 %v367_v43  ;;  %v140_v55 = vadd.f32 %v139_v51, %v130_v46  ;;  %v147_v57 = vmul.f32 %v146_v49, %v143_v27  ;;  %v427_v61 = vadd.f32 -0.5, %v144_v48  ;;  %v247_v48 = vld [vmem:[#allocation8 + $0x38] sm:$0xff]  ;;  %v173_v51 = vld [vmem:[#allocation7 + $0x28] sm:$0xff] }
  0x7c   :  { %458 = vpow2.f32 %v374_v45  ;;  %vm851_vm8 = vcmp.lt.f32.partialorder %v154_v50, 1.0  ;;  %v157_v63 = vmul.f32 %v156_v52, %v153_v28  ;;  %v428_v0 = vadd.f32 -0.5, %v154_v50  ;;  %v171_v50 = vld [vmem:[#allocation7 + $0x20] sm:$0xff] }
  0x7d   :  { %460 = vpow2.f32 %v266_v53  ;;  %v269_v2 = vmul.f32 0.2, %v122_v19  ;;  %v273_v3 = vmul.f32 0.1, %v824_v9  ;;  %v149_v4 = vsel %vm845_vm7, %v147_v57, %v427_v61  ;;  %v177_v61 = vld [vmem:[#allocation7 + $0x38] sm:$0xff] }
  0x7e   :  { %v860_v5 = vmul.f32 0.1, %v118_v14  ;;  %v188_v8 = vsub.f32 %v849_v58, %v187_v60  ;;  %v150_v12 = vadd.f32 %v149_v4, %v140_v55  ;;  %v159_v13 = vsel %vm851_vm8, %v157_v63, %v428_v0  ;;  %v175_v60 = vld [vmem:[#allocation7 + $0x30] sm:$0xff] }
  0x7f   :  { %v270_v15 = vmul.f32 1.442695, %v269_v2  ;;  %v869_v9 = vmul.f32 %v273_v3, %v855_v1  ;;  %v180_v14 = vand.u32 2147483647, %v179_v7  ;;  %v182_v17 = vmul.f32 0.5, %v179_v7 }
  0x80   :  { %v189_v19 = vand.u32 2147483647, %v188_v8  ;;  %v191_v20 = vmul.f32 0.5, %v188_v8  ;;  %v160_v21 = vadd.f32 %v159_v13, %v150_v12  ;;  %v198_v22 = vsub.f32 %v862_v6, %v197_v10 }
  0x81   :  { %462 = vpow2.f32 %v270_v15  ;;  %v208_v23 = vsub.f32 %v871_v16, %v207_v11  ;;  %vm875_vm9 = vcmp.lt.f32.partialorder %v180_v14, 1.0  ;;  %v183_v26 = vmul.f32 %v182_v17, %v179_v7 }
  0x82   :  { %v429_v27 = vadd.f32 -0.5, %v180_v14  ;;  %vm879_vm10 = vcmp.lt.f32.partialorder %v189_v19, 1.0  ;;  %v161_v30 = vmul.f32 %v826_v18, %v160_v21  ;;  %v192_v31 = vmul.f32 %v191_v20, %v188_v8 }
  0x83   :  { %v453_v29 = vpop.eup %452  ;;  %v430_v32 = vadd.f32 -0.5, %v189_v19  ;;  %v199_v33 = vand.u32 2147483647, %v198_v22  ;;  %v201_v36 = vmul.f32 0.5, %v198_v22  ;;  %v209_v38 = vand.u32 2147483647, %v208_v23 }
  0x84   :  { %v455_v34 = vpop.eup %454  ;;  %v185_v35 = vsel %vm875_vm9, %v183_v26, %v429_v27  ;;  %v211_v39 = vmul.f32 0.5, %v208_v23  ;;  %385 = vst [vmem:[#allocation14] sm:$0xff] %v161_v30  ;;  %v218_v63 = vsub.f32 %v171_v50, %v217_v40  ;;  %v228_v0 = vsub.f32 %v173_v51, %v227_v41  ;;  %v258_v41 = vld [vmem:[#allocation10] sm:$0xff] }
  0x85   :  { %v457_v42 = vpop.eup %456  ;;  %v362_v43 = vadd.f32 %v455_v34, %v453_v29  ;;  %v194_v44 = vsel %vm879_vm10, %v192_v31, %v430_v32  ;;  %vm888_vm11 = vcmp.lt.f32.partialorder %v199_v33, 1.0  ;;  %v431_v46 = vadd.f32 -0.5, %v199_v33 }
  0x86   :  { %v459_v49 = vpop.eup %458  ;;  %v195_v52 = vadd.f32 %v194_v44, %v185_v35  ;;  %v202_v53 = vmul.f32 %v201_v36, %v198_v22  ;;  %vm892_vm12 = vcmp.lt.f32.partialorder %v209_v38, 1.0  ;;  %v212_v56 = vmul.f32 %v211_v39, %v208_v23  ;;  %v264_v22 = vld [vmem:[#allocation10 + $0x18] sm:$0xff] }
  0x87   :  { %v461_v57 = vpop.eup %460  ;;  %v369_v59 = vadd.f32 %v457_v42, %v362_v43  ;;  %v432_v62 = vadd.f32 -0.5, %v209_v38  ;;  %v238_v3 = vsub.f32 %v175_v60, %v237_v47  ;;  %v248_v4 = vsub.f32 %v177_v61, %v247_v48 }
  0x88   :  { %v204_v2 = vsel %vm888_vm11, %v202_v53, %v431_v46  ;;  %v285_v7 = vmul.f32 0.1, %v855_v1  ;;  %v219_v12 = vand.u32 2147483647, %v218_v63  ;;  %v221_v13 = vmul.f32 0.5, %v218_v63  ;;  %v260_v53 = vld [vmem:[#allocation10 + $0x8] sm:$0xff] }
  0x89   :  { %v376_v8 = vadd.f32 %v459_v49, %v369_v59  ;;  %v205_v10 = vadd.f32 %v204_v2, %v195_v52  ;;  %v214_v11 = vsel %vm892_vm12, %v212_v56, %v432_v62  ;;  %v229_v15 = vand.u32 2147483647, %v228_v0 }
  0x8a   :  { %v231_v14 = vmul.f32 0.5, %v228_v0  ;;  %v239_v17 = vand.u32 2147483647, %v238_v3  ;;  %vm220_vm13 = vcmp.lt.f32.partialorder %v219_v12, 1.0  ;;  %v433_v21 = vadd.f32 -0.5, %v219_v12 }
  0x8b   :  { %v463_v19 = vpop.eup %462  ;;  %464 = vlog2.f32 %v376_v8  ;;  %v215_v20 = vadd.f32 %v214_v11, %v205_v10  ;;  %v222_v23 = vmul.f32 %v221_v13, %v218_v63  ;;  %vm901_vm14 = vcmp.lt.f32.partialorder %v229_v15, 1.0 }
  0x8c   :  { %v232_v26 = vmul.f32 %v231_v14, %v228_v0  ;;  %v434_v27 = vadd.f32 -0.5, %v229_v15  ;;  %vm905_vm15 = vcmp.lt.f32.partialorder %v239_v17, 1.0  ;;  %v241_v29 = vmul.f32 0.5, %v238_v3 }
  0x8d   :  { %v435_v30 = vadd.f32 -0.5, %v239_v17  ;;  %v249_v31 = vand.u32 2147483647, %v248_v4  ;;  %v224_v32 = vsel %vm220_vm13, %v222_v23, %v433_v21  ;;  %v251_v34 = vmul.f32 0.5, %v248_v4 }
  0x8e   :  { %v234_v33 = vsel %vm901_vm14, %v232_v26, %v434_v27  ;;  %v286_v35 = vmul.f32 0.1, %v264_v22  ;;  %v225_v36 = vadd.f32 %v224_v32, %v215_v20  ;;  %v242_v38 = vmul.f32 %v241_v29, %v238_v3 }
  0x8f   :  { %vm911_vm0 = vcmp.lt.f32.partialorder %v249_v31, 1.0  ;;  %v436_v40 = vadd.f32 -0.5, %v249_v31  ;;  %v252_v42 = vmul.f32 %v251_v34, %v248_v4  ;;  %v295_v44 = vmul.f32 %v285_v7, %v171_v50 }
  0x90   :  { %v293_v43 = vmul.f32 %v286_v35, %v871_v16  ;;  %v297_v45 = vmul.f32 %v286_v35, %v173_v51  ;;  %v235_v46 = vadd.f32 %v234_v33, %v225_v36  ;;  %v244_v47 = vsel %vm905_vm15, %v242_v38, %v435_v30 }
  0x91   :  { %v299_v48 = vmul.f32 %v285_v7, %v175_v60  ;;  %v301_v49 = vmul.f32 %v286_v35, %v177_v61  ;;  %v254_v52 = vsel %vm911_vm0, %v252_v42, %v436_v40  ;;  %v268_v55 = vmul.f32 %v461_v57, %v855_v1 }
  0x92   :  { %v272_v56 = vmul.f32 %v463_v19, %v264_v22  ;;  %v275_v59 = vadd.f32 %v869_v9, %v258_v41  ;;  %v245_v62 = vadd.f32 %v244_v47, %v235_v46  ;;  %v279_v50 = vmul.f32 %v860_v5, %v264_v22 }
  0x93   :  { %v300_v63 = vadd.f32 %v299_v48, %v258_v41  ;;  %v302_v16 = vadd.f32 %v301_v49, %v260_v53  ;;  %v276_v51 = vmul.f32 0.5, %v268_v55  ;;  %v287_v2 = vmul.f32 %v285_v7, %v843_v54 }
  0x94   :  { %v281_v0 = vmul.f32 0.5, %v272_v56  ;;  %v289_v60 = vmul.f32 %v286_v35, %v849_v58  ;;  %v255_v3 = vadd.f32 %v254_v52, %v245_v62  ;;  %v280_v4 = vadd.f32 %v279_v50, %v260_v53 }
  0x95   :  { %v465_v61 = vpop.eup %464  ;;  %v291_v8 = vmul.f32 %v285_v7, %v862_v6  ;;  %v294_v1 = vadd.f32 %v293_v43, %v260_v53  ;;  %v277_v10 = vsub.f32 %v275_v59, %v276_v51  ;;  %v288_v9 = vadd.f32 %v287_v2, %v258_v41 }
  0x96   :  { %v381_v57 = vmul.f32 0.6931472, %v465_v61  ;;  %v290_v11 = vadd.f32 %v289_v60, %v260_v53  ;;  %v256_v12 = vmul.f32 %v826_v18, %v255_v3  ;;  %v282_v13 = vsub.f32 %v280_v4, %v281_v0 }
  0x97   :  { %v292_v5 = vadd.f32 %v291_v8, %v258_v41  ;;  %v296_v15 = vadd.f32 %v295_v44, %v258_v41  ;;  %v283_v58 = vadd.f32 %v277_v10, %v268_v55  ;;  %v298_v14 = vadd.f32 %v297_v45, %v260_v53 }
  0x98   :  { %v382_v54 = vadd.f32 %v381_v57, %v829_v25  ;;  %v303_v17 = vmin.f32 %v288_v9, %v300_v63  ;;  %387 = vst [vmem:[#allocation14 + $0x8] sm:$0xff] %v256_v12  ;;  %v284_v19 = vadd.f32 %v282_v13, %v272_v56  ;;  %v312_v6 = vmin.f32 %v290_v11, %v294_v1 }
  0x99   :  { %v322_v7 = vmax.f32 %v292_v5, %v296_v15  ;;  %v332_v22 = vmax.f32 %v298_v14, %v302_v16 }
  0x9a   :  { %v383_v20 = vsub.f32 %v382_v54, %v835_v37  ;;  %v304_v21 = vsub.f32 %v303_v17, %v277_v10  ;;  %v313_v23 = vsub.f32 %v312_v6, %v282_v13 }
  0x9b   :  { %v323_v24 = vsub.f32 %v322_v7, %v283_v58  ;;  %v333_v27 = vsub.f32 %v332_v22, %v284_v19 }
  0x9c   :  { %384 = vst [vmem:[#allocation13] sm:$0xff] %v383_v20  ;;  %v305_v26 = vmul.f32 10.0, %v304_v21  ;;  %v314_v28 = vmul.f32 10.0, %v313_v23 }
  0x9d   :  { %v324_v29 = vmul.f32 10.0, %v323_v24 }
  0x9e   :  { %609 = shalt.err (!%p606_p10)
}
  0x9f   :  { %s610_s15 = scalar_lea.hbm %s964_s7, 128 }
  0xa0   :  { %p611_p11 = scmp.ne.s32.totalorder %s964_s7, %s610_s15  ;;  %p614_p12 = scmp.lt.u32.totalorder %s610_s15, %s964_s7 }
  0xa2   :  { %p616_p13 = pnand %p614_p12, %p611_p11 }
  0xa4   :  { %619 = shalt.err (!%p616_p13)
}
  0xa5   :  { %399 = dma.vmem_to_hbm [thread:$0]  %s397_s6, 128, %s964_s7, [#allocation4]   ;;  %v306_v25 = vand.u32 2147483647, %v305_v26  ;;  %v308_v37 = vmul.f32 0.5, %v305_v26  ;;  %v334_v30 = vmul.f32 10.0, %v333_v27 }
  0xa6   :  { %v315_v31 = vand.u32 2147483647, %v314_v28  ;;  %v317_v32 = vmul.f32 0.5, %v314_v28  ;;  %v325_v33 = vand.u32 2147483647, %v324_v29  ;;  %v327_v34 = vmul.f32 0.5, %v324_v29 }
  0xa7   :  { %vm307_vm1 = vcmp.lt.f32.partialorder %v306_v25, 1.0  ;;  %v309_v35 = vmul.f32 %v308_v37, %v305_v26  ;;  %v437_v36 = vadd.f32 -0.5, %v306_v25  ;;  %v335_v38 = vand.u32 2147483647, %v334_v30  ;;  %s664_s7 = smov [#allocation14]  }
  0xa8   :  { %vm316_vm2 = vcmp.lt.f32.partialorder %v315_v31, 1.0  ;;  %v318_v39 = vmul.f32 %v317_v32, %v314_v28  ;;  %v438_v40 = vadd.f32 -0.5, %v315_v31  ;;  %vm326_vm3 = vcmp.lt.f32.partialorder %v325_v33, 1.0  ;;  %s405_s2 = sshll.u32 %s664_s7, 4  ;;  %s406_s2 = int_to_ptr.vmem [resolvable:$true] %s405_s2 }
  0xa9   :  { %v311_v41 = vsel %vm307_vm1, %v309_v35, %v437_v36  ;;  %v328_v42 = vmul.f32 %v327_v34, %v324_v29  ;;  %v439_v43 = vadd.f32 -0.5, %v325_v33  ;;  %v337_v45 = vmul.f32 0.5, %v334_v30  ;;  %s620_s12 = scalar_lea.vmem %s406_s2, 384  ;;  %p625_p1 = scmp.lt.s32.totalorder %s406_s2, %s406_s2 }
  0xaa   :  { %v320_v44 = vsel %vm316_vm2, %v318_v39, %v438_v40  ;;  %v440_v46 = vadd.f32 -0.5, %v335_v38  ;;  %vm336_vm4 = vcmp.lt.f32.partialorder %v335_v38, 1.0  ;;  %p621_p0 = scmp.ne.s32.totalorder %s406_s2, %s620_s12  ;;  %p626_p2 = scmp.lt.s32.totalorder %s620_s12, %s620_s12 }
  0xab   :  { %v321_v47 = vadd.f32 %v320_v44, %v311_v41  ;;  %v330_v48 = vsel %vm326_vm3, %v328_v42, %v439_v43  ;;  %v338_v49 = vmul.f32 %v337_v45, %v334_v30 }
  0xac   :  { %p627_p3 = por %p626_p2, %p625_p1 }
  0xad   :  { %v331_v52 = vadd.f32 %v330_v48, %v321_v47  ;;  %v340_v53 = vsel %vm336_vm4, %v338_v49, %v440_v46 }
  0xae   :  { %p628_p4 = pnand %p627_p3, %p621_p0 }
  0xaf   :  { %v341_v55 = vadd.f32 %v340_v53, %v331_v52 }
  0xb1   :  { %v342_v56 = vmul.f32 %v826_v18, %v341_v55 }
  0xb3   :  { %389 = vst [vmem:[#allocation14 + $0x10] sm:$0xff] %v342_v56 }
  0xb4   :  { %631 = shalt.err (!%p628_p4)
}
  0xb5   :  { %s632_s24 = scalar_lea.hbm %s965_s8, 384 }
  0xb6   :  { %p633_p5 = scmp.ne.s32.totalorder %s965_s8, %s632_s24  ;;  %p636_p6 = scmp.lt.u32.totalorder %s632_s24, %s965_s8 }
  0xb8   :  { %p638_p7 = pnand %p636_p6, %p633_p5 }
  0xba   :  { %641 = shalt.err (!%p638_p7)
}
  0xbb   :  { %411 = dma.vmem_to_hbm [thread:$0]  %s406_s2, 384, %s965_s8, [#allocation15], %s656_s17, %s656_s17, %s657_s18  }
  0xbc   :  { %650 = dma.done.wait [#allocation4], 128  }
  0xbd   :  { %651 = vsyncadd [#allocation4], 4294967168 }
  0xbe   :  { %652 = dma.done.wait [#allocation15], 384  }
  0xbf   :  { %653 = vsyncadd [#allocation15], 4294966912 }
  0xc0   :  { %418 = vsyncpa [#allocation3], 1 }
  0xc1   :  { %419 = vsyncpa [#allocation6], 1 }
  0xc2   :  { %420 = vsyncpa [#allocation9], 1 }
  0xc3   :  { %421 = vsyncpa [#allocation12], 1 }
  0xc4   :  { %422 = vsyncpa [#allocation4], 1 }
  0xc5   :  { %423 = vsyncpa [#allocation15], 1 }

</bundles_post_ra>
